<compile_context>
chip_gen: v7x
topology: tpu7x:2x2x1
jax: 0.10.0
libtpu: 0.0.40
codegen_flags: <defaults>
</compile_context>

<pallas_src>
import jax
import jax.numpy as jnp
from jax.experimental import pallas as pl
from jax.experimental.pallas import tpu as pltpu

# Logical model dims (the "deep-copied model").
D_IN, D_HID, D_OUT = 32, 64, 16
# Padded dims:
#   D_IN_P : K of layer 1 = D_IN + 1 (ones column for the b1 fold) rounded up to the
#            bf16 sublane pack; 64 is allowed because the BlockSpec covers the full
#            array extent on that axis.
#   D_HID_P: per-particle hidden chunk = D_HID + 1 (ones carrier for the b2 fold),
#            rounded to a full 128-lane register so the packed layer-1 N is lane-dense.
#   D_OUT_P: layer-2 N kept at one lane register; kernel stores only the first D_OUT.
D_IN_P, D_HID_P, D_OUT_P = 64, 128, 128


# ----------------------------- Pallas kernel ------------------------------ #
def particle_mlp_kernel(x_ref, w1_ref, w2_ref, o_ref):
    # x_ref : (tb, D_IN_P)           bf16 batch tile; column D_IN holds the constant 1.0
    # w1_ref: (D_IN_P, P*D_HID_P)    bf16; all particles' augmented W1 packed along N
    # w2_ref: (P, D_HID_P, D_OUT_P)  bf16; per-particle augmented W2 (b2 folded)
    # o_ref : (P, tb, D_OUT)         f32 unpadded output (masked store, tiny slab)
    P = w2_ref.shape[0]
    x = x_ref[...]

    # Layer 1 for ALL particles in one wide MXU pass (N = P*128 = 512 here).
    h = jnp.dot(x, w1_ref[...], preferred_element_type=jnp.float32)
    h = jnp.maximum(h, 0.0)                 # ReLU in f32 (v5e-safe); ones carrier stays 1
    h = h.astype(w2_ref.dtype)              # bf16 for the 2nd MXU pass

    # Layer 2 per particle: static 128-lane-aligned slices, unrolled at trace time.
    for p in range(P):
        h_p = h[:, p * D_HID_P:(p + 1) * D_HID_P]                   # (tb, 128)
        y_p = jnp.dot(h_p, w2_ref[p], preferred_element_type=jnp.float32)
        o_ref[p] = y_p[:, :D_OUT].astype(o_ref.dtype)               # unpadded store


def particles_forward(x_aug, w1_cat, w2_aug, *, batch_tile=128):
    """Fused forward of P particles over one batch: relu(x@W1+b1)@W2+b2.

    x_aug : (B, D_IN_P)              bf16, ones column (bias fold) already in place
    w1_cat: (D_IN_P, P*D_HID_P)      bf16 augmented first-layer weights, packed over N
    w2_aug: (P, D_HID_P, D_OUT_P)    bf16 augmented second-layer weights
    returns (P, B, D_OUT) float32
    """
    P = w2_aug.shape[0]
    B = x_aug.shape[0]
    tb = min(batch_tile, B)
    assert B % tb == 0, "batch must tile evenly into batch_tile"
    grid = (B // tb,)

    flops = 2 * B * D_IN_P * (P * D_HID_P) + 2 * P * B * D_HID_P * D_OUT_P
    bytes_accessed = (x_aug.size * x_aug.dtype.itemsize
                      + w1_cat.size * w1_cat.dtype.itemsize
                      + w2_aug.size * w2_aug.dtype.itemsize
                      + P * B * D_OUT * 4)

    return pl.pallas_call(
        particle_mlp_kernel,
        out_shape=jax.ShapeDtypeStruct((P, B, D_OUT), jnp.float32),
        grid_spec=pltpu.PrefetchScalarGridSpec(
            num_scalar_prefetch=0,
            grid=grid,
            in_specs=[
                pl.BlockSpec((tb, D_IN_P), lambda i: (i, 0)),                 # x tile
                pl.BlockSpec((D_IN_P, P * D_HID_P), lambda i: (0, 0)),        # W1_cat (resident)
                pl.BlockSpec((P, D_HID_P, D_OUT_P), lambda i: (0, 0, 0)),     # W2_aug (resident)
            ],
            out_specs=pl.BlockSpec((P, tb, D_OUT), lambda i: (0, i, 0)),
        ),
        compiler_params=pltpu.CompilerParams(
            dimension_semantics=("parallel",)),
        cost_estimate=pl.CostEstimate(
            flops=flops, transcendentals=0, bytes_accessed=bytes_accessed),
    )(x_aug, w1_cat, w2_aug)


# --------------------------- Particle "class" ----------------------------- #
_PARAM_ORDER = ("w1", "b1", "w2", "b2")   # PyTorch module parameter order


def init_particle_params(key, d_in=D_IN, d_hid=D_HID, d_out=D_OUT, dtype=jnp.float32):
    """Particle.__init__: every parameter of the copied model <- randn_like(p).
    PyTorch Linear layout: weight [out, in], bias [out]."""
    k1, k2, k3, k4 = jax.random.split(key, 4)
    return {
        "w1": jax.random.normal(k1, (d_hid, d_in), dtype),
        "b1": jax.random.normal(k2, (d_hid,), dtype),
        "w2": jax.random.normal(k3, (d_out, d_hid), dtype),
        "b2": jax.random.normal(k4, (d_out,), dtype),
    }


def get_params(params):
    """Particle.get_params: parameters flattened into one 1-D vector."""
    return jnp.concatenate([params[n].reshape(-1) for n in _PARAM_ORDER])


def set_params(params, new_flat):
    """Particle.set_params: unflatten a 1-D vector back into the param tree."""
    out, off = {}, 0
    for n in _PARAM_ORDER:
        shp = params[n].shape
        cnt = 1
        for s in shp:
            cnt *= s
        out[n] = new_flat[off:off + cnt].reshape(shp).astype(params[n].dtype)
        off += cnt
    return out

# TODO(synk): get_gradient() reads .grad off the torch module; the JAX
# equivalent is jax.grad over particles_forward, not a kernel concern.


# -------------------- padding / bias-folding wrapper glue ------------------ #
def pack_particle_weights(particle_params, dtype=jnp.bfloat16):
    """Pack particle param dicts into MXU-friendly, bias-folded slabs.

    For particle p, columns [p*128, p*128+D_HID) of W1_cat hold W1_p^T with b1_p on
    row D_IN; column p*128+D_HID is the ones carrier so that after ReLU (max(1,0)=1)
    the b2_p row of W2_aug[p] adds the second bias.
    """
    P = len(particle_params)
    w1_cat = jnp.zeros((D_IN_P, P * D_HID_P), jnp.float32)
    w2_list = []
    for pi, p in enumerate(particle_params):
        c0 = pi * D_HID_P
        w1_cat = w1_cat.at[:D_IN, c0:c0 + D_HID].set(p["w1"].T.astype(jnp.float32))
        w1_cat = w1_cat.at[D_IN, c0:c0 + D_HID].set(p["b1"].astype(jnp.float32))
        w1_cat = w1_cat.at[D_IN, c0 + D_HID].set(1.0)      # carry the ones column through

        w2 = jnp.zeros((D_HID_P, D_OUT_P), jnp.float32)
        w2 = w2.at[:D_HID, :D_OUT].set(p["w2"].T.astype(jnp.float32))
        w2 = w2.at[D_HID, :D_OUT].set(p["b2"].astype(jnp.float32))
        w2_list.append(w2.astype(dtype))
    return w1_cat.astype(dtype), jnp.stack(w2_list)


def pad_inputs(x, dtype=jnp.bfloat16):
    """Pad x to (B, D_IN_P); column D_IN is the constant 1 (bias fold)."""
    B = x.shape[0]
    x_aug = jnp.zeros((B, D_IN_P), jnp.float32)
    x_aug = x_aug.at[:, :D_IN].set(x.astype(jnp.float32))
    x_aug = x_aug.at[:, D_IN].set(1.0)
    return x_aug.astype(dtype)


# --------------------------------- main ----------------------------------- #
if __name__ == "__main__":
    P, B = 4, 256   # population of 4 particles, 256-row batch (2 tiles of 128)

    key = jax.random.PRNGKey(0)
    keys = jax.random.split(key, P + 1)
    kx, kp = keys[0], keys[1:]

    x = jax.random.normal(kx, (B, D_IN), jnp.float32)
    particles = [init_particle_params(k) for k in kp]

    # Round-trip the flatten / unflatten path (Particle.get_params / set_params).
    particles = [set_params(p, get_params(p)) for p in particles]

    w1_cat, w2_aug = pack_particle_weights(particles)
    x_aug = pad_inputs(x)

    y = particles_forward(x_aug, w1_cat, w2_aug, batch_tile=128)
    jax.block_until_ready(y)
    assert y.shape == (P, B, D_OUT)

    # Reference in plain JAX using the same bf16-input / f32-accumulate path.
    x_bf = x.astype(jnp.bfloat16)
    for pi, p in enumerate(particles):
        w1_bf = p["w1"].T.astype(jnp.bfloat16)
        b1 = p["b1"].astype(jnp.bfloat16).astype(jnp.float32)
        w2_bf = p["w2"].T.astype(jnp.bfloat16)
        b2 = p["b2"].astype(jnp.bfloat16).astype(jnp.float32)
        h = jnp.dot(x_bf, w1_bf, preferred_element_type=jnp.float32) + b1
        h = jnp.maximum(h, 0.0).astype(jnp.bfloat16)
        ref = jnp.dot(h, w2_bf, preferred_element_type=jnp.float32) + b2
        assert jnp.allclose(y[pi], ref, atol=5e-2, rtol=2e-2), (
            "max abs err:", float(jnp.max(jnp.abs(y[pi] - ref))))

    print("KERNEL_OK")
</pallas_src>

<mosaic_0001>
module attributes {stable_mosaic.version = 11 : i64} {
  func.func @particle_mlp_kernel(%arg0: i32, %arg1: memref<128x64xbf16, #tpu.memory_space<vmem>>, %arg2: memref<64x512xbf16, #tpu.memory_space<vmem>>, %arg3: memref<4x128x128xbf16, #tpu.memory_space<vmem>>, %arg4: memref<4x128x16xf32, #tpu.memory_space<vmem>>) attributes {dimension_semantics = [#tpu.dimension_semantics<parallel>], iteration_bounds = array<i64: 2>, scalar_prefetch = 0 : i64, scratch_operands = 0 : i64, tpu.core_type = #tpu.core_type<tc>, window_params = [{transform_indices = @transform_0, window_bounds = array<i64: 128, 64>}, {pipeline_mode = #tpu.pipeline_mode<synchronous>, transform_indices = @transform_1, window_bounds = array<i64: 64, 512>}, {pipeline_mode = #tpu.pipeline_mode<synchronous>, transform_indices = @transform_2, window_bounds = array<i64: 4, 128, 128>}, {transform_indices = @transform_3, window_bounds = array<i64: 4, 128, 16>}]} {
    %c0 = arith.constant 0 : index
    %c0_0 = arith.constant 0 : index
    %0 = vector.load %arg1[%c0, %c0_0] : memref<128x64xbf16, #tpu.memory_space<vmem>>, vector<128x64xbf16>
    %c0_1 = arith.constant 0 : index
    %c0_2 = arith.constant 0 : index
    %1 = vector.load %arg2[%c0_1, %c0_2] : memref<64x512xbf16, #tpu.memory_space<vmem>>, vector<64x512xbf16>
    %cst = arith.constant dense<0.000000e+00> : vector<128x512xf32>
    %2 = tpu.matmul %0, %1, %cst {dimension_numbers = #tpu.dot_dimension_numbers<[1], [0], [0], [1], [0, 0, 1, 1], [], []>} : vector<128x64xbf16>, vector<64x512xbf16>, vector<128x512xf32> -> vector<128x512xf32>
    %cst_3 = arith.constant 0.000000e+00 : f32
    %3 = vector.broadcast %cst_3 : f32 to vector<128x512xf32>
    %4 = arith.maximumf %2, %3 : vector<128x512xf32>
    %5 = arith.truncf %4 : vector<128x512xf32> to vector<128x512xbf16>
    %6 = vector.extract_strided_slice %5 {offsets = [0, 0], sizes = [128, 128], strides = [1, 1]} : vector<128x512xbf16> to vector<128x128xbf16>
    %c0_4 = arith.constant 0 : index
    %c0_5 = arith.constant 0 : index
    %c0_6 = arith.constant 0 : index
    %7 = vector.load %arg3[%c0_4, %c0_5, %c0_6] : memref<4x128x128xbf16, #tpu.memory_space<vmem>>, vector<1x128x128xbf16>
    %8 = vector.shape_cast %7 : vector<1x128x128xbf16> to vector<128x128xbf16>
    %cst_7 = arith.constant dense<0.000000e+00> : vector<128x128xf32>
    %9 = tpu.matmul %6, %8, %cst_7 {dimension_numbers = #tpu.dot_dimension_numbers<[1], [0], [0], [1], [0, 0, 1, 1], [], []>} : vector<128x128xbf16>, vector<128x128xbf16>, vector<128x128xf32> -> vector<128x128xf32>
    %10 = vector.extract_strided_slice %9 {offsets = [0, 0], sizes = [128, 16], strides = [1, 1]} : vector<128x128xf32> to vector<128x16xf32>
    %c0_8 = arith.constant 0 : index
    %c0_9 = arith.constant 0 : index
    %c0_10 = arith.constant 0 : index
    %11 = vector.load %arg4[%c0_8, %c0_9, %c0_10] : memref<4x128x16xf32, #tpu.memory_space<vmem>>, vector<1x128x16xf32>
    %12 = vector.shape_cast %11 : vector<1x128x16xf32> to vector<128x16xf32>
    %13 = vector.shape_cast %10 : vector<128x16xf32> to vector<1x128x16xf32>
    tpu.vector_store %arg4[%c0_8, %c0_9, %c0_10], %13 {strides = array<i32>} : memref<4x128x16xf32, #tpu.memory_space<vmem>>, vector<1x128x16xf32>,
    %14 = vector.extract_strided_slice %5 {offsets = [0, 128], sizes = [128, 128], strides = [1, 1]} : vector<128x512xbf16> to vector<128x128xbf16>
    %c1 = arith.constant 1 : index
    %c0_11 = arith.constant 0 : index
    %c0_12 = arith.constant 0 : index
    %15 = vector.load %arg3[%c1, %c0_11, %c0_12] : memref<4x128x128xbf16, #tpu.memory_space<vmem>>, vector<1x128x128xbf16>
    %16 = vector.shape_cast %15 : vector<1x128x128xbf16> to vector<128x128xbf16>
    %cst_13 = arith.constant dense<0.000000e+00> : vector<128x128xf32>
    %17 = tpu.matmul %14, %16, %cst_13 {dimension_numbers = #tpu.dot_dimension_numbers<[1], [0], [0], [1], [0, 0, 1, 1], [], []>} : vector<128x128xbf16>, vector<128x128xbf16>, vector<128x128xf32> -> vector<128x128xf32>
    %18 = vector.extract_strided_slice %17 {offsets = [0, 0], sizes = [128, 16], strides = [1, 1]} : vector<128x128xf32> to vector<128x16xf32>
    %c1_14 = arith.constant 1 : index
    %c0_15 = arith.constant 0 : index
    %c0_16 = arith.constant 0 : index
    %19 = vector.load %arg4[%c1_14, %c0_15, %c0_16] : memref<4x128x16xf32, #tpu.memory_space<vmem>>, vector<1x128x16xf32>
    %20 = vector.shape_cast %19 : vector<1x128x16xf32> to vector<128x16xf32>
    %21 = vector.shape_cast %18 : vector<128x16xf32> to vector<1x128x16xf32>
    tpu.vector_store %arg4[%c1_14, %c0_15, %c0_16], %21 {strides = array<i32>} : memref<4x128x16xf32, #tpu.memory_space<vmem>>, vector<1x128x16xf32>,
    %22 = vector.extract_strided_slice %5 {offsets = [0, 256], sizes = [128, 128], strides = [1, 1]} : vector<128x512xbf16> to vector<128x128xbf16>
    %c2 = arith.constant 2 : index
    %c0_17 = arith.constant 0 : index
    %c0_18 = arith.constant 0 : index
    %23 = vector.load %arg3[%c2, %c0_17, %c0_18] : memref<4x128x128xbf16, #tpu.memory_space<vmem>>, vector<1x128x128xbf16>
    %24 = vector.shape_cast %23 : vector<1x128x128xbf16> to vector<128x128xbf16>
    %cst_19 = arith.constant dense<0.000000e+00> : vector<128x128xf32>
    %25 = tpu.matmul %22, %24, %cst_19 {dimension_numbers = #tpu.dot_dimension_numbers<[1], [0], [0], [1], [0, 0, 1, 1], [], []>} : vector<128x128xbf16>, vector<128x128xbf16>, vector<128x128xf32> -> vector<128x128xf32>
    %26 = vector.extract_strided_slice %25 {offsets = [0, 0], sizes = [128, 16], strides = [1, 1]} : vector<128x128xf32> to vector<128x16xf32>
    %c2_20 = arith.constant 2 : index
    %c0_21 = arith.constant 0 : index
    %c0_22 = arith.constant 0 : index
    %27 = vector.load %arg4[%c2_20, %c0_21, %c0_22] : memref<4x128x16xf32, #tpu.memory_space<vmem>>, vector<1x128x16xf32>
    %28 = vector.shape_cast %27 : vector<1x128x16xf32> to vector<128x16xf32>
    %29 = vector.shape_cast %26 : vector<128x16xf32> to vector<1x128x16xf32>
    tpu.vector_store %arg4[%c2_20, %c0_21, %c0_22], %29 {strides = array<i32>} : memref<4x128x16xf32, #tpu.memory_space<vmem>>, vector<1x128x16xf32>,
    %30 = vector.extract_strided_slice %5 {offsets = [0, 384], sizes = [128, 128], strides = [1, 1]} : vector<128x512xbf16> to vector<128x128xbf16>
    %c3 = arith.constant 3 : index
    %c0_23 = arith.constant 0 : index
    %c0_24 = arith.constant 0 : index
    %31 = vector.load %arg3[%c3, %c0_23, %c0_24] : memref<4x128x128xbf16, #tpu.memory_space<vmem>>, vector<1x128x128xbf16>
    %32 = vector.shape_cast %31 : vector<1x128x128xbf16> to vector<128x128xbf16>
    %cst_25 = arith.constant dense<0.000000e+00> : vector<128x128xf32>
    %33 = tpu.matmul %30, %32, %cst_25 {dimension_numbers = #tpu.dot_dimension_numbers<[1], [0], [0], [1], [0, 0, 1, 1], [], []>} : vector<128x128xbf16>, vector<128x128xbf16>, vector<128x128xf32> -> vector<128x128xf32>
    %34 = vector.extract_strided_slice %33 {offsets = [0, 0], sizes = [128, 16], strides = [1, 1]} : vector<128x128xf32> to vector<128x16xf32>
    %c3_26 = arith.constant 3 : index
    %c0_27 = arith.constant 0 : index
    %c0_28 = arith.constant 0 : index
    %35 = vector.load %arg4[%c3_26, %c0_27, %c0_28] : memref<4x128x16xf32, #tpu.memory_space<vmem>>, vector<1x128x16xf32>
    %36 = vector.shape_cast %35 : vector<1x128x16xf32> to vector<128x16xf32>
    %37 = vector.shape_cast %34 : vector<128x16xf32> to vector<1x128x16xf32>
    tpu.vector_store %arg4[%c3_26, %c0_27, %c0_28], %37 {strides = array<i32>} : memref<4x128x16xf32, #tpu.memory_space<vmem>>, vector<1x128x16xf32>,
    return
  }
  func.func @transform_0(%arg0: i32) -> (i32, i32) {
    %c0_i32 = arith.constant 0 : i32
    %c0_i32_0 = arith.constant 0 : i32
    return %arg0, %c0_i32 : i32, i32
  }
  func.func @transform_1(%arg0: i32) -> (i32, i32) {
    %c0_i32 = arith.constant 0 : i32
    %c0_i32_0 = arith.constant 0 : i32
    %c0_i32_1 = arith.constant 0 : i32
    return %c0_i32, %c0_i32_0 : i32, i32
  }
  func.func @transform_2(%arg0: i32) -> (i32, i32, i32) {
    %c0_i32 = arith.constant 0 : i32
    %c0_i32_0 = arith.constant 0 : i32
    %c0_i32_1 = arith.constant 0 : i32
    %c0_i32_2 = arith.constant 0 : i32
    return %c0_i32, %c0_i32_0, %c0_i32_1 : i32, i32, i32
  }
  func.func @transform_3(%arg0: i32) -> (i32, i32, i32) {
    %c0_i32 = arith.constant 0 : i32
    %c0_i32_0 = arith.constant 0 : i32
    %c0_i32_1 = arith.constant 0 : i32
    return %c0_i32, %arg0, %c0_i32_0 : i32, i32, i32
  }
}

</mosaic_0001>

<bundles_post_ra>
// kernel: tpu_custom_call.1
= control target key start
LH: loop header
LB: loop body
LE: loop exit
PB: predicated region body
PF: predicated region fallthrough
CT: control target
= control target key end

     0   :  { %8 = vsyncpa [#allocation3], 0  ;;  %s2264_s12 = smov 0   ;;  %s2266_s13 = smov 0   ;;  %s2729_s0 = inlined_call_operand.vmem [shape: bf16[256,64], index: 0, kind: input, shape index: {}]   ;;  %s2730_s1 = inlined_call_operand.vmem [shape: bf16[64,512], index: 1, kind: input, shape index: {}]   ;;  %s2731_s2 = inlined_call_operand.hbm [shape: bf16[4,128,128], index: 2, kind: input, shape index: {}]   ;;  %s2732_s3 = inlined_call_operand.vmem [shape: f32[4,256,16], index: 3, kind: output, shape index: {}]  }
   0x1   :  { %s2268_s14 = smov 0  }
   0x2 LB: > { %s2277_s15 = sadd.s32 4294967295, %s2238_s14   ;;  %s2279_s16 = sadd.s32 1, %s2238_s14   ;;  %s2238_s14 = sphi %s2268_s14, %s2744_s14   ;;  %s2234_s13 = sphi %s2266_s13, %s2743_s13   ;;  %s2230_s12 = sphi %s2264_s12, %s2742_s12  }
   0x3   : > { %s86_s17 = ssub.s32 %s2238_s14, %s2279_s16  ;;  %s89_s18 = sadd.s32 1, %s2234_s13 }
   0x4   : > { %p87_p0 = scmp.eq.s32.totalorder %s86_s17, 0  ;;  %p99_p1 = scmp.ne.s32.totalorder %s2234_s13, %s2230_s12 }
   0x5   : > { %p100_p2 = scmp.eq.s32.totalorder %s2277_s15, 1  ;;  %p1756_p3 = scmp.ge.s32.totalorder %s2238_s14, 1 }
   0x6   : > { %s2287_s19 = scalar_select %p87_p0, %s2234_s13, %s89_s18  }
   0x7   : > { %p2289_p4 = por %p100_p2, %p99_p1  ;;  %p113_p5 = scmp.lt.s32.totalorder %s2238_s14, 3 }
   0x8   : > { %p2733_p6 = scmp.eq.s32.totalorder %s2277_s15, 0  ;;  %s2240_s22 = smov [#allocation2]  }
   0x9   : > { %s2735_s20 = scalar_select %p2289_p4, 1, 0 }
   0xa   : > { %p2294_p7 = pnand %p1756_p3, %p113_p5  ;;  %s128_s23 = sshll.u32 %s2240_s22, 4  ;;  %s129_s23 = int_to_ptr.vmem [resolvable:$true] %s128_s23 }
   0xb   : > { %s2184_s27 = scalar_lea.hbm %s2731_s2, 4096 }
   0xc   : > { %s2736_s21 = scalar_select %p2294_p7, 1, 0 }
   0xd   : > { %p2086_p8 = pneg %p2294_p7  ;;  %p2185_p10 = scmp.ne.s32.totalorder %s2731_s2, %s2184_s27 }
   0xe   : > { %p2191_p0 = scmp.lt.u32.totalorder %s2184_s27, %s2731_s2 }
   0xf   : > { %p2302_p9 = pnand %p2733_p6, %p2086_p8 }
  0x11   : > { %p2186_p11 = pneg %p2302_p9 }
  0x13   : > { %p2187_p12 = pnand %p2186_p11, %p2185_p10 }
  0x15   : > { %p2188_p13 = pneg %p2187_p12 }
  0x17   : > { %p2193_p1 = pnand %p2191_p0, %p2188_p13 }
  0x19   : > { %2196 = shalt.err (!%p2193_p1)
}
  0x1a   : > { %s2197_s5 = scalar_lea.vmem %s129_s23, 4096  ;;  %p2205_p8 = scmp.lt.s32.totalorder %s129_s23, %s129_s23 }
  0x1b   : > { %p2198_p2 = scmp.ne.s32.totalorder %s129_s23, %s2197_s5  ;;  %p2206_p6 = scmp.lt.s32.totalorder %s2197_s5, %s2197_s5 }
  0x1d   : > { %p2200_p3 = pnand %p2198_p2, %p2186_p11  ;;  %p2207_p4 = por %p2206_p6, %p2205_p8 }
  0x1f   : > { %p2201_p5 = pneg %p2200_p3 }
  0x21   : > { %p2208_p7 = pnand %p2207_p4, %p2201_p5 }
  0x23   : > { %2211 = shalt.err (!%p2208_p7)
}
  0x24   : > { %s2241_s6 = smov 64   ;;  %s2242_s7 = smov 4  }
  0x25   : > { %2089 = dma.hbm_to_vmem [thread:$0]  (!%p2302_p9), %s2731_s2, 4096, %s129_s23, [#allocation3], %s2241_s6, %s2241_s6, %s2242_s7  }
  0x26   : > { %p2738_p10 = scmp.ne.s32.totalorder %s2736_s21, 0 }
  0x27   : > { %p2739_p12 = scmp.eq.s32.totalorder (!%p2738_p10), %s2277_s15, 0 }
  0x28   : > { %153 = sbr.rel (%p2738_p10) target bundleno = 598 (0x256), region = 32 }
  0x2f   : > { %2225 = dma.done.wait (%p2739_p12), [#allocation3], 4096   ;;  %p2740_p11 = pmov %p2739_p12 }
  0x30   : > { %s1762_s10 = sshll.u32 %s2277_s15, 4  ;;  %v2243_v0 = vmov 0   ;;  %v2120_v1 = vld [vmem:[%s2730_s1 + $0x4] ss:$16 sps:$4 sm:$0xff]   ;;  %v2122_v2 = vld [vmem:[%s2730_s1] ss:$16 sps:$4 sm:$0xff]  }
  0x31   : > { %2227 = vsyncadd (%p2740_p11), [#allocation3], 4294963200  ;;  %393 = vmatprep.mubr.bf16.mxu0 %v2243_v0  ;;  %p177_p4 = scmp.lt.s32.totalorder %s1762_s10, 31  ;;  %506 = vmatprep.mubr.bf16.mxu1 %v2243_v0  ;;  %v2123_v3 = vld [vmem:[%s2730_s1 + $0x24] ss:$16 sps:$4 sm:$0xff]   ;;  %vm336_vm0 = vcmask 523264  }
  0x32   : > { %361 = vmatprep.subr.bf16.mxu0 %v2120_v1  ;;  %v2125_v4 = vld [vmem:[%s2730_s1 + $0x20] ss:$16 sps:$4 sm:$0xff]   ;;  %v2126_v5 = vld [vmem:[%s2730_s1 + $0x44] ss:$16 sps:$4 sm:$0xff]   ;;  %v2134_v8 = vld [vmem:[%s2730_s1 + $0xc] ss:$16 sps:$4 sm:$0xff]  }
  0x33   : > { %s2746_s10 = smov (!%p177_p4, %s1762_s10), 31  ;;  %362 = vmatpush1.bf16.msra.mxu0 %v2122_v2  ;;  %v2128_v6 = vld [vmem:[%s2730_s1 + $0x40] ss:$16 sps:$4 sm:$0xff]   ;;  %v2129_v7 = vld [vmem:[%s2730_s1 + $0x64] ss:$16 sps:$4 sm:$0xff]   ;;  %474 = vmatprep.subr.bf16.mxu1 %v2134_v8  ;;  %v2154_v20 = vld [vmem:[#allocation2 + $0x8] sm:$0xff]  }
  0x34   : > { %s1763_s21 = sshll.u32 %s2746_s10, 2  ;;  %363 = vmatprep.subr.bf16.mxu0 %v2123_v3  ;;  %v2136_v9 = vld [vmem:[%s2730_s1 + $0x8] ss:$16 sps:$4 sm:$0xff]   ;;  %v2131_v10 = vld [vmem:[%s2730_s1 + $0x60] ss:$16 sps:$4 sm:$0xff]   ;;  %vm844_vm1 = vcmask 130048  }
  0x35   : > { %s2349_s30 = scalar_lea.vmem %s2729_s0, %s1763_s21  ;;  %v2138_v11 = vld [vmem:[%s2730_s1 + $0x2c] ss:$16 sps:$4 sm:$0xff]   ;;  %475 = vmatpush1.bf16.msra.mxu1 %v2136_v9  ;;  %v2140_v12 = vld [vmem:[%s2730_s1 + $0x28] ss:$16 sps:$4 sm:$0xff]   ;;  %v2152_v18 = vld [vmem:[#allocation2] sm:$0xff]   ;;  %p2741_p6 = scmp.ne.s32.totalorder %s2735_s20, 0 }
  0x36   : > { %476 = vmatprep.subr.bf16.mxu1 %v2138_v11  ;;  %v2141_v13 = vld [vmem:[%s2730_s1 + $0x4c] ss:$16 sps:$4 sm:$0xff]   ;;  %v2132_v14 = vld [vmem:[%s2349_s30] sm:$0xff]   ;;  %v2143_v15 = vld [vmem:[%s2730_s1 + $0x48] ss:$16 sps:$4 sm:$0xff]  }
  0x37   : > { %364 = vmatpush1.bf16.msra.mxu0 %v2125_v4  ;;  %v2145_v16 = vld [vmem:[%s2730_s1 + $0x6c] ss:$16 sps:$4 sm:$0xff]   ;;  %v2147_v17 = vld [vmem:[%s2730_s1 + $0x68] ss:$16 sps:$4 sm:$0xff]   ;;  %v2153_v19 = vld [vmem:[#allocation2 + $0x40] sm:$0xff]  }
  0x38   : > { %365 = vmatprep.subr.bf16.mxu0 %v2126_v5  ;;  %v2133_v21 = vld [vmem:[%s2349_s30 + $0x8] sm:$0xff]   ;;  %v2156_v23 = vld [vmem:[#allocation2 + $0x10] sm:$0xff]   ;;  %v2158_v25 = vld [vmem:[#allocation2 + $0x18] sm:$0xff]  }
  0x39   : > { %477 = vmatpush1.bf16.msra.mxu1 %v2140_v12  ;;  %v2155_v22 = vld [vmem:[#allocation2 + $0x48] sm:$0xff]   ;;  %v2157_v24 = vld [vmem:[#allocation2 + $0x50] sm:$0xff]   ;;  %v2159_v27 = vld [vmem:[#allocation2 + $0x58] sm:$0xff]  }
  0x3a   : > { %478 = vmatprep.subr.bf16.mxu1 %v2141_v13  ;;  %v2137_v26 = vld [vmem:[%s2349_s30 + $0x10] sm:$0xff]   ;;  %v2160_v28 = vld [vmem:[#allocation2 + $0x20] sm:$0xff]   ;;  %v2144_v29 = vld [vmem:[%s2349_s30 + $0x18] sm:$0xff]  }
  0x3b   : > { %366 = vmatpush1.bf16.msra.mxu0 %v2128_v6  ;;  %v2148_v30 = vld [vmem:[%s2349_s30 + $0x20] sm:$0xff]   ;;  %v2149_v31 = vld [vmem:[%s2349_s30 + $0x28] sm:$0xff]   ;;  %v2150_v32 = vld [vmem:[%s2349_s30 + $0x30] sm:$0xff]  }
  0x3c   : > { %367 = vmatprep.subr.bf16.mxu0 %v2129_v7  ;;  %v2151_v33 = vld [vmem:[%s2349_s30 + $0x38] sm:$0xff]   ;;  %v2161_v34 = vld [vmem:[#allocation2 + $0x60] sm:$0xff]   ;;  %v2162_v35 = vld [vmem:[#allocation2 + $0x28] sm:$0xff]   ;;  %s173_s30 = sand.u32 1, %s2230_s12   ;;  %s1889_s12 = sshll.u32 (%p2741_p6), %s2277_s15, 7 }
  0x3d   : > { %479 = vmatpush1.bf16.msra.mxu1 %v2143_v15  ;;  %v2163_v36 = vld [vmem:[#allocation2 + $0x68] sm:$0xff]   ;;  %v2164_v37 = vld [vmem:[#allocation2 + $0x30] sm:$0xff]   ;;  %v2166_v39 = vld [vmem:[#allocation2 + $0x38] sm:$0xff]   ;;  %s1761_s6 = sshll.u32 %s173_s30, 9  ;;  %s2592_s10 = scalar_lea.vmem (%p2741_p6), %s2732_s3, %s1889_s12 }
  0x3e   : > { %480 = vmatprep.subr.bf16.mxu1 %v2145_v16  ;;  %v2165_v38 = vld [vmem:[#allocation2 + $0x70] sm:$0xff]   ;;  %v2167_v40 = vld [vmem:[#allocation2 + $0x78] sm:$0xff]   ;;  %v2168_v41 = vld [vmem:[#allocation2 + $0x80] sm:$0xff]   ;;  %s2453_s7 = scalar_lea.vmem [#allocation4], %s1761_s6 }
  0x3f   : > { %368 = vmatpush1.bf16.msra.mxu0 %v2131_v10  ;;  %v2169_v42 = vld [vmem:[#allocation2 + $0xc0] sm:$0xff]   ;;  %v2170_v7 = vld [vmem:[#allocation2 + $0x88] sm:$0xff]   ;;  %v2172_v16 = vld [vmem:[#allocation2 + $0x90] sm:$0xff]  }
  0x40   : > { %1954 = vmatprep.subr.bf16.mxu0 %v2152_v18  ;;  %v2171_v10 = vld [vmem:[#allocation2 + $0xc8] sm:$0xff]  }
  0x41   : > { %481 = vmatpush1.bf16.msra.mxu1 %v2147_v17 }
  0x42   : > { %1788 = vmatmul.mubr.msk.bf16.vlgmr.msra.gmra.mrb[0].mxu0 %vm336_vm0, %v2132_v14  ;;  %1986 = vmatprep.subr.bf16.mxu1 %v2153_v19 }
  0x43   : > { %403 = vmatprep.mubr.bf16.mxu0 %v2243_v0  ;;  %1955 = vmatpush3.bf16.msra.mxu0 %v2152_v18 }
  0x44   : > { %1956 = vmatprep.subr.bf16.mxu0 %v2154_v20  ;;  %1796 = vmatmul.mubr.msk.bf16.vlgmr.msra.gmra.mrb[0].mxu1 %vm336_vm0, %v2132_v14 }
  0x45   : > { %516 = vmatprep.mubr.bf16.mxu1 %v2243_v0  ;;  %1987 = vmatpush3.bf16.msra.mxu1 %v2153_v19 }
  0x46   : > { %1988 = vmatprep.subr.bf16.mxu1 %v2155_v22 }
  0x47   : > { %1957 = vmatpush3.bf16.msra.mxu0 %v2154_v20  ;;  %v2173_v20 = vld [vmem:[#allocation2 + $0xd0] sm:$0xff]  }
  0x48   : > { %1958 = vmatprep.subr.bf16.mxu0 %v2156_v23 }
  0x49   : > { %1989 = vmatpush3.bf16.msra.mxu1 %v2155_v22 }
  0x4a   : > { %1789 = vmatmul.mubr.msk.bf16.gmra.mrb[4].mxu0 %vm336_vm0, %v2133_v21  ;;  %1990 = vmatprep.subr.bf16.mxu1 %v2157_v24 }
  0x4b   : > { %413 = vmatprep.mubr.bf16.mxu0 %v2243_v0  ;;  %1959 = vmatpush3.bf16.msra.mxu0 %v2156_v23 }
  0x4c   : > { %1960 = vmatprep.subr.bf16.mxu0 %v2158_v25  ;;  %1797 = vmatmul.mubr.msk.bf16.gmra.mrb[4].mxu1 %vm336_vm0, %v2133_v21 }
  0x4d   : > { %526 = vmatprep.mubr.bf16.mxu1 %v2243_v0  ;;  %1991 = vmatpush3.bf16.msra.mxu1 %v2157_v24 }
  0x4e   : > { %1992 = vmatprep.subr.bf16.mxu1 %v2159_v27 }
  0x4f   : > { %1961 = vmatpush3.bf16.msra.mxu0 %v2158_v25 }
  0x50   : > { %1962 = vmatprep.subr.bf16.mxu0 %v2160_v28 }
  0x51   : > { %1993 = vmatpush3.bf16.msra.mxu1 %v2159_v27 }
  0x52   : > { %1790 = vmatmul.mubr.msk.bf16.gmra.mrb[8].mxu0 %vm336_vm0, %v2137_v26  ;;  %1994 = vmatprep.subr.bf16.mxu1 %v2161_v34 }
  0x53   : > { %423 = vmatprep.mubr.bf16.mxu0 %v2243_v0  ;;  %1963 = vmatpush3.bf16.msra.mxu0 %v2160_v28 }
  0x54   : > { %1798 = vmatmul.mubr.msk.bf16.gmra.mrb[8].mxu1 %vm336_vm0, %v2137_v26  ;;  %1964 = vmatprep.subr.bf16.mxu0 %v2162_v35 }
  0x55   : > { %536 = vmatprep.mubr.bf16.mxu1 %v2243_v0  ;;  %1995 = vmatpush3.bf16.msra.mxu1 %v2161_v34  ;;  %v2175_v34 = vld [vmem:[#allocation2 + $0xd8] sm:$0xff]  }
  0x56   : > { %1996 = vmatprep.subr.bf16.mxu1 %v2163_v36 }
  0x57   : > { %1965 = vmatpush3.bf16.msra.mxu0 %v2162_v35 }
  0x58   : > { %1966 = vmatprep.subr.bf16.mxu0 %v2164_v37 }
  0x59   : > { %1997 = vmatpush3.bf16.msra.mxu1 %v2163_v36 }
  0x5a   : > { %1791 = vmatmul.mubr.msk.bf16.gmra.mrb[12].mxu0 %vm336_vm0, %v2144_v29  ;;  %1998 = vmatprep.subr.bf16.mxu1 %v2165_v38 }
  0x5b   : > { %433 = vmatprep.mubr.bf16.mxu0 %v2243_v0  ;;  %1967 = vmatpush3.bf16.msra.mxu0 %v2164_v37 }
  0x5c   : > { %1799 = vmatmul.mubr.msk.bf16.gmra.mrb[12].mxu1 %vm336_vm0, %v2144_v29  ;;  %1968 = vmatprep.subr.bf16.mxu0 %v2166_v39 }
  0x5d   : > { %546 = vmatprep.mubr.bf16.mxu1 %v2243_v0  ;;  %1999 = vmatpush3.bf16.msra.mxu1 %v2165_v38 }
  0x5e   : > { %2000 = vmatprep.subr.bf16.mxu1 %v2167_v40 }
  0x5f   : > { %1969 = vmatpush3.bf16.msra.mxu0 %v2166_v39 }
  0x60   : > { %2018 = vmatprep.subr.bf16.mxu0 %v2168_v41 }
  0x61   : > { %2001 = vmatpush3.bf16.msra.mxu1 %v2167_v40  ;;  %v2176_v40 = vld [vmem:[#allocation2 + $0xa0] sm:$0xff]  }
  0x62   : > { %1792 = vmatmul.mubr.msk.bf16.gmra.mrb[16].mxu0 %vm336_vm0, %v2148_v30  ;;  %2050 = vmatprep.subr.bf16.mxu1 %v2169_v42 }
  0x63   : > { %443 = vmatprep.mubr.bf16.mxu0 %v2243_v0 }
  0x64   : > { %1800 = vmatmul.mubr.msk.bf16.gmra.mrb[16].mxu1 %vm336_vm0, %v2148_v30 }
  0x65   : > { %556 = vmatprep.mubr.bf16.mxu1 %v2243_v0 }
  0x6a   : > { %1793 = vmatmul.mubr.msk.bf16.gmra.mrb[20].mxu0 %vm336_vm0, %v2149_v31 }
  0x6b   : > { %453 = vmatprep.mubr.bf16.mxu0 %v2243_v0 }
  0x6c   : > { %1801 = vmatmul.mubr.msk.bf16.gmra.mrb[20].mxu1 %vm336_vm0, %v2149_v31  ;;  %v2174_v31 = vld [vmem:[#allocation2 + $0x98] sm:$0xff]  }
  0x6d   : > { %566 = vmatprep.mubr.bf16.mxu1 %v2243_v0 }
  0x72   : > { %1794 = vmatmul.mubr.msk.bf16.gmra.mrb[24].mxu0 %vm336_vm0, %v2150_v32 }
  0x73   : > { %463 = vmatprep.mubr.bf16.mxu0 %v2243_v0 }
  0x74   : > { %1802 = vmatmul.mubr.msk.bf16.gmra.mrb[24].mxu1 %vm336_vm0, %v2150_v32 }
  0x75   : > { %576 = vmatprep.mubr.bf16.mxu1 %v2243_v0 }
  0x7a   : > { %1795 = vmatmul.mubr.msk.bf16.gmra.mrb[28].mxu0 %vm336_vm0, %v2151_v33 }
  0x7c   : > { %1803 = vmatmul.mubr.msk.bf16.gmra.mrb[28].mxu1 %vm336_vm0, %v2151_v33 }
 0x115   : > { %v395_v43 = vpop.f32.mrb[0].mxu0 }
 0x116   : > { %v397_v44 = vpop.f32.mrb[1].mxu0  ;;  %v587_v46 = vmax.f32 %v395_v43, 0.0 }
 0x117   : > { %v399_v45 = vpop.f32.mrb[2].mxu0  ;;  %v588_v49 = vmax.f32 %v397_v44, 0.0  ;;  %v508_v54 = vpop.f32.mrb[0].mxu1  ;;  %v2177_v44 = vld [vmem:[#allocation2 + $0xe0] sm:$0xff]  }
 0x118   : > { %v591_v47 = vmax.f32 %v399_v45, 0.0  ;;  %v401_v48 = vpop.f32.mrb[3].mxu0  ;;  %v589_v56 = vmax.f32 %v508_v54, 0.0  ;;  %v510_v57 = vpop.f32.mrb[1].mxu1 }
 0x119   : > { %v592_v50 = vmax.f32 %v401_v48, 0.0  ;;  %v590_v59 = vmax.f32 %v510_v57, 0.0  ;;  %v512_v60 = vpop.f32.mrb[2].mxu1 }
 0x11a   : > { %v651_v51 = vpack.c.bf16 %v591_v47, %v587_v46  ;;  %v593_v0 = vmax.f32 %v512_v60, 0.0  ;;  %v514_v1 = vpop.f32.mrb[3].mxu1 }
 0x11b   : > { %v652_v52 = vpack.c.bf16 %v592_v50, %v588_v49  ;;  %v594_v4 = vmax.f32 %v514_v1, 0.0 }
 0x11c   : > { %1970 = vmatprep.mubr.bf16.mxu0 %v651_v51  ;;  %v2422_v6 = vpack.c.bf16 %v593_v0, %v589_v56  ;;  %v2180_v0 = vld [vmem:[#allocation2 + $0xb0] sm:$0xff]  }
 0x11d   : > { %v405_v53 = vpop.f32.mrb[4].mxu0  ;;  %2002 = vmatprep.mubr.bf16.mxu1 %v652_v52  ;;  %v2424_v9 = vpack.c.bf16 %v594_v4, %v590_v59  ;;  %v2181_v4 = vld [vmem:[#allocation2 + $0xf0] sm:$0xff]  }
 0x11e   : > { %v407_v55 = vpop.f32.mrb[5].mxu0  ;;  %v595_v61 = vmax.f32 %v405_v53, 0.0 }
 0x11f   : > { %v409_v58 = vpop.f32.mrb[6].mxu0  ;;  %v596_v2 = vmax.f32 %v407_v55, 0.0  ;;  %v518_v12 = vpop.f32.mrb[4].mxu1  ;;  %v2178_v55 = vld [vmem:[#allocation2 + $0xa8] sm:$0xff]  }
 0x120   : > { %v599_v62 = vmax.f32 %v409_v58, 0.0  ;;  %v411_v63 = vpop.f32.mrb[7].mxu0  ;;  %v597_v14 = vmax.f32 %v518_v12, 0.0  ;;  %v520_v15 = vpop.f32.mrb[5].mxu1  ;;  %v2179_v58 = vld [vmem:[#allocation2 + $0xe8] sm:$0xff]  }
 0x121   : > { %v600_v3 = vmax.f32 %v411_v63, 0.0  ;;  %v598_v18 = vmax.f32 %v520_v15, 0.0  ;;  %v522_v19 = vpop.f32.mrb[6].mxu1 }
 0x122   : > { %v655_v5 = vpack.c.bf16 %v599_v62, %v595_v61  ;;  %v601_v24 = vmax.f32 %v522_v19, 0.0  ;;  %v524_v25 = vpop.f32.mrb[7].mxu1 }
 0x123   : > { %v656_v8 = vpack.c.bf16 %v600_v3, %v596_v2  ;;  %v602_v28 = vmax.f32 %v524_v25, 0.0 }
 0x124   : > { %1971 = vmatmul.mubr.bf16.vlgmr.msra.gmra.mrb[32].mxu0 %v655_v5  ;;  %v2426_v30 = vpack.c.bf16 %v601_v24, %v597_v14 }
 0x125   : > { %v415_v11 = vpop.f32.mrb[8].mxu0  ;;  %2003 = vmatmul.mubr.bf16.vlgmr.msra.gmra.mrb[32].mxu1 %v656_v8  ;;  %2019 = vmatpush3.bf16.msra.mxu0 %v2168_v41  ;;  %v2428_v33 = vpack.c.bf16 %v602_v28, %v598_v18 }
 0x126   : > { %v417_v13 = vpop.f32.mrb[9].mxu0  ;;  %2051 = vmatpush3.bf16.msra.mxu1 %v2169_v42  ;;  %2020 = vmatprep.subr.bf16.mxu0 %v2170_v7  ;;  %v603_v21 = vmax.f32 %v415_v11, 0.0 }
 0x127   : > { %v419_v17 = vpop.f32.mrb[10].mxu0  ;;  %2052 = vmatprep.subr.bf16.mxu1 %v2171_v10  ;;  %v604_v26 = vmax.f32 %v417_v13, 0.0  ;;  %v528_v36 = vpop.f32.mrb[8].mxu1 }
 0x128   : > { %v607_v22 = vmax.f32 %v419_v17, 0.0  ;;  %v421_v23 = vpop.f32.mrb[11].mxu0  ;;  %v605_v38 = vmax.f32 %v528_v36, 0.0  ;;  %v530_v39 = vpop.f32.mrb[9].mxu1  ;;  %v2182_v17 = vld [vmem:[#allocation2 + $0xb8] sm:$0xff]  }
 0x129   : > { %v608_v27 = vmax.f32 %v421_v23, 0.0  ;;  %2021 = vmatpush3.bf16.msra.mxu0 %v2170_v7  ;;  %v606_v42 = vmax.f32 %v530_v39, 0.0  ;;  %v532_v43 = vpop.f32.mrb[10].mxu1 }
 0x12a   : > { %v659_v29 = vpack.c.bf16 %v607_v22, %v603_v21  ;;  %2053 = vmatpush3.bf16.msra.mxu1 %v2171_v10  ;;  %2022 = vmatprep.subr.bf16.mxu0 %v2172_v16  ;;  %v609_v48 = vmax.f32 %v532_v43, 0.0  ;;  %v534_v49 = vpop.f32.mrb[11].mxu1 }
 0x12b   : > { %v660_v32 = vpack.c.bf16 %v608_v27, %v604_v26  ;;  %2054 = vmatprep.subr.bf16.mxu1 %v2173_v20  ;;  %v610_v52 = vmax.f32 %v534_v49, 0.0 }
 0x12c   : > { %1974 = vmatprep.mubr.bf16.mxu0 %v659_v29  ;;  %v2430_v54 = vpack.c.bf16 %v609_v48, %v605_v38 }
 0x12d   : > { %v425_v35 = vpop.f32.mrb[12].mxu0  ;;  %2006 = vmatprep.mubr.bf16.mxu1 %v660_v32  ;;  %2023 = vmatpush3.bf16.msra.mxu0 %v2172_v16  ;;  %v2432_v57 = vpack.c.bf16 %v610_v52, %v606_v42 }
 0x12e   : > { %v427_v37 = vpop.f32.mrb[13].mxu0  ;;  %2055 = vmatpush3.bf16.msra.mxu1 %v2173_v20  ;;  %2024 = vmatprep.subr.bf16.mxu0 %v2174_v31  ;;  %v611_v45 = vmax.f32 %v425_v35, 0.0  ;;  %v2183_v20 = vld [vmem:[#allocation2 + $0xf8] sm:$0xff]  }
 0x12f   : > { %v429_v41 = vpop.f32.mrb[14].mxu0  ;;  %2056 = vmatprep.subr.bf16.mxu1 %v2175_v34  ;;  %v612_v50 = vmax.f32 %v427_v37, 0.0  ;;  %v538_v60 = vpop.f32.mrb[12].mxu1 }
 0x130   : > { %v615_v46 = vmax.f32 %v429_v41, 0.0  ;;  %v431_v47 = vpop.f32.mrb[15].mxu0  ;;  %v613_v62 = vmax.f32 %v538_v60, 0.0  ;;  %v540_v63 = vpop.f32.mrb[13].mxu1 }
 0x131   : > { %v616_v51 = vmax.f32 %v431_v47, 0.0  ;;  %2025 = vmatpush3.bf16.msra.mxu0 %v2174_v31  ;;  %v614_v2 = vmax.f32 %v540_v63, 0.0  ;;  %v542_v3 = vpop.f32.mrb[14].mxu1 }
 0x132   : > { %v663_v53 = vpack.c.bf16 %v615_v46, %v611_v45  ;;  %2057 = vmatpush3.bf16.msra.mxu1 %v2175_v34  ;;  %2026 = vmatprep.subr.bf16.mxu0 %v2176_v40  ;;  %v617_v10 = vmax.f32 %v542_v3, 0.0  ;;  %v544_v11 = vpop.f32.mrb[15].mxu1 }
 0x133   : > { %v664_v56 = vpack.c.bf16 %v616_v51, %v612_v50  ;;  %2058 = vmatprep.subr.bf16.mxu1 %v2177_v44  ;;  %v618_v14 = vmax.f32 %v544_v11, 0.0 }
 0x134   : > { %1975 = vmatmul.mubr.bf16.gmra.mrb[36].mxu0 %v663_v53  ;;  %v2434_v16 = vpack.c.bf16 %v617_v10, %v613_v62 }
 0x135   : > { %v435_v59 = vpop.f32.mrb[16].mxu0  ;;  %2007 = vmatmul.mubr.bf16.gmra.mrb[36].mxu1 %v664_v56  ;;  %2027 = vmatpush3.bf16.msra.mxu0 %v2176_v40  ;;  %v2436_v19 = vpack.c.bf16 %v618_v14, %v614_v2 }
 0x136   : > { %v437_v61 = vpop.f32.mrb[17].mxu0  ;;  %2059 = vmatpush3.bf16.msra.mxu1 %v2177_v44  ;;  %2028 = vmatprep.subr.bf16.mxu0 %v2178_v55  ;;  %v619_v5 = vmax.f32 %v435_v59, 0.0 }
 0x137   : > { %v439_v1 = vpop.f32.mrb[18].mxu0  ;;  %2060 = vmatprep.subr.bf16.mxu1 %v2179_v58  ;;  %v620_v12 = vmax.f32 %v437_v61, 0.0  ;;  %v548_v22 = vpop.f32.mrb[16].mxu1 }
 0x138   : > { %v623_v7 = vmax.f32 %v439_v1, 0.0  ;;  %v441_v8 = vpop.f32.mrb[19].mxu0  ;;  %v621_v24 = vmax.f32 %v548_v22, 0.0  ;;  %v550_v25 = vpop.f32.mrb[17].mxu1 }
 0x139   : > { %v624_v13 = vmax.f32 %v441_v8, 0.0  ;;  %2029 = vmatpush3.bf16.msra.mxu0 %v2178_v55  ;;  %v622_v27 = vmax.f32 %v550_v25, 0.0  ;;  %v552_v28 = vpop.f32.mrb[18].mxu1 }
 0x13a   : > { %v667_v15 = vpack.c.bf16 %v623_v7, %v619_v5  ;;  %2061 = vmatpush3.bf16.msra.mxu1 %v2179_v58  ;;  %2030 = vmatprep.subr.bf16.mxu0 %v2180_v0  ;;  %v625_v34 = vmax.f32 %v552_v28, 0.0  ;;  %v554_v35 = vpop.f32.mrb[19].mxu1 }
 0x13b   : > { %v668_v18 = vpack.c.bf16 %v624_v13, %v620_v12  ;;  %2062 = vmatprep.subr.bf16.mxu1 %v2181_v4  ;;  %v626_v38 = vmax.f32 %v554_v35, 0.0 }
 0x13c   : > { %1978 = vmatprep.mubr.bf16.mxu0 %v667_v15  ;;  %v2438_v40 = vpack.c.bf16 %v625_v34, %v621_v24 }
 0x13d   : > { %v445_v21 = vpop.f32.mrb[20].mxu0  ;;  %2010 = vmatprep.mubr.bf16.mxu1 %v668_v18  ;;  %2031 = vmatpush3.bf16.msra.mxu0 %v2180_v0  ;;  %v2440_v42 = vpack.c.bf16 %v626_v38, %v622_v27 }
 0x13e   : > { %v447_v23 = vpop.f32.mrb[21].mxu0  ;;  %2063 = vmatpush3.bf16.msra.mxu1 %v2181_v4  ;;  %2032 = vmatprep.subr.bf16.mxu0 %v2182_v17  ;;  %v627_v29 = vmax.f32 %v445_v21, 0.0 }
 0x13f   : > { %v449_v26 = vpop.f32.mrb[22].mxu0  ;;  %2064 = vmatprep.subr.bf16.mxu1 %v2183_v20  ;;  %v628_v36 = vmax.f32 %v447_v23, 0.0  ;;  %v558_v44 = vpop.f32.mrb[20].mxu1 }
 0x140   : > { %v631_v31 = vmax.f32 %v449_v26, 0.0  ;;  %v451_v32 = vpop.f32.mrb[23].mxu0  ;;  %v629_v46 = vmax.f32 %v558_v44, 0.0  ;;  %v560_v47 = vpop.f32.mrb[21].mxu1 }
 0x141   : > { %v632_v37 = vmax.f32 %v451_v32, 0.0  ;;  %2033 = vmatpush3.bf16.msra.mxu0 %v2182_v17  ;;  %v630_v49 = vmax.f32 %v560_v47, 0.0  ;;  %v562_v50 = vpop.f32.mrb[22].mxu1 }
 0x142   : > { %v671_v39 = vpack.c.bf16 %v631_v31, %v627_v29  ;;  %2065 = vmatpush3.bf16.msra.mxu1 %v2183_v20  ;;  %v633_v55 = vmax.f32 %v562_v50, 0.0  ;;  %v564_v56 = vpop.f32.mrb[23].mxu1 }
 0x143   : > { %v672_v41 = vpack.c.bf16 %v632_v37, %v628_v36  ;;  %v634_v60 = vmax.f32 %v564_v56, 0.0 }
 0x144   : > { %1979 = vmatmul.mubr.bf16.gmra.mrb[40].mxu0 %v671_v39  ;;  %v673_v62 = vpack.c.bf16 %v633_v55, %v629_v46 }
 0x145   : > { %v455_v43 = vpop.f32.mrb[24].mxu0  ;;  %2011 = vmatmul.mubr.bf16.gmra.mrb[40].mxu1 %v672_v41  ;;  %v674_v0 = vpack.c.bf16 %v634_v60, %v630_v49 }
 0x146   : > { %v457_v45 = vpop.f32.mrb[25].mxu0  ;;  %v635_v51 = vmax.f32 %v455_v43, 0.0 }
 0x147   : > { %v459_v48 = vpop.f32.mrb[26].mxu0  ;;  %v636_v58 = vmax.f32 %v457_v45, 0.0  ;;  %v568_v2 = vpop.f32.mrb[24].mxu1 }
 0x148   : > { %v639_v52 = vmax.f32 %v459_v48, 0.0  ;;  %v461_v53 = vpop.f32.mrb[27].mxu0  ;;  %v637_v4 = vmax.f32 %v568_v2, 0.0  ;;  %v570_v5 = vpop.f32.mrb[25].mxu1 }
 0x149   : > { %v640_v59 = vmax.f32 %v461_v53, 0.0  ;;  %v638_v8 = vmax.f32 %v570_v5, 0.0  ;;  %v572_v10 = vpop.f32.mrb[26].mxu1 }
 0x14a   : > { %v675_v61 = vpack.c.bf16 %v639_v52, %v635_v51  ;;  %v641_v14 = vmax.f32 %v572_v10, 0.0  ;;  %v574_v15 = vpop.f32.mrb[27].mxu1 }
 0x14b   : > { %v676_v63 = vpack.c.bf16 %v640_v59, %v636_v58  ;;  %v642_v20 = vmax.f32 %v574_v15, 0.0 }
 0x14c   : > { %1982 = vmatprep.mubr.bf16.mxu0 %v675_v61  ;;  %v677_v22 = vpack.c.bf16 %v641_v14, %v637_v4 }
 0x14d   : > { %v465_v1 = vpop.f32.mrb[28].mxu0  ;;  %2014 = vmatprep.mubr.bf16.mxu1 %v676_v63  ;;  %v678_v24 = vpack.c.bf16 %v642_v20, %v638_v8 }
 0x14e   : > { %v467_v3 = vpop.f32.mrb[29].mxu0  ;;  %v643_v11 = vmax.f32 %v465_v1, 0.0 }
 0x14f   : > { %v469_v7 = vpop.f32.mrb[30].mxu0  ;;  %v644_v17 = vmax.f32 %v467_v3, 0.0  ;;  %v578_v25 = vpop.f32.mrb[28].mxu1 }
 0x150   : > { %v647_v12 = vmax.f32 %v469_v7, 0.0  ;;  %v471_v13 = vpop.f32.mrb[31].mxu0  ;;  %v645_v26 = vmax.f32 %v578_v25, 0.0  ;;  %v580_v27 = vpop.f32.mrb[29].mxu1 }
 0x151   : > { %v648_v18 = vmax.f32 %v471_v13, 0.0  ;;  %v646_v28 = vmax.f32 %v580_v27, 0.0  ;;  %v582_v29 = vpop.f32.mrb[30].mxu1 }
 0x152   : > { %v679_v21 = vpack.c.bf16 %v647_v12, %v643_v11  ;;  %v649_v31 = vmax.f32 %v582_v29, 0.0  ;;  %v584_v32 = vpop.f32.mrb[31].mxu1 }
 0x153   : > { %v680_v23 = vpack.c.bf16 %v648_v18, %v644_v17  ;;  %v650_v34 = vmax.f32 %v584_v32, 0.0 }
 0x154   : > { %1983 = vmatmul.mubr.bf16.gmra.mrb[44].mxu0 %v679_v21  ;;  %v681_v35 = vpack.c.bf16 %v649_v31, %v645_v26 }
 0x155   : > { %2015 = vmatmul.mubr.bf16.gmra.mrb[44].mxu1 %v680_v23  ;;  %2034 = vmatprep.mubr.bf16.mxu0 %v2422_v6  ;;  %v682_v36 = vpack.c.bf16 %v650_v34, %v646_v28 }
 0x156   : > { %2066 = vmatprep.mubr.bf16.mxu1 %v2424_v9 }
 0x15c   : > { %2035 = vmatmul.mubr.bf16.vlgmr.msra.gmra.mrb[48].mxu0 %v2426_v30 }
 0x15d   : > { %2038 = vmatprep.mubr.bf16.mxu0 %v2430_v54  ;;  %2067 = vmatmul.mubr.bf16.vlgmr.msra.gmra.mrb[48].mxu1 %v2428_v33 }
 0x15e   : > { %2070 = vmatprep.mubr.bf16.mxu1 %v2432_v57 }
 0x164   : > { %2039 = vmatmul.mubr.bf16.gmra.mrb[52].mxu0 %v2434_v16 }
 0x165   : > { %2042 = vmatprep.mubr.bf16.mxu0 %v2438_v40  ;;  %2071 = vmatmul.mubr.bf16.gmra.mrb[52].mxu1 %v2436_v19 }
 0x166   : > { %2074 = vmatprep.mubr.bf16.mxu1 %v2440_v42 }
 0x16c   : > { %2043 = vmatmul.mubr.bf16.gmra.mrb[56].mxu0 %v673_v62 }
 0x16d   : > { %2046 = vmatprep.mubr.bf16.mxu0 %v677_v22  ;;  %2075 = vmatmul.mubr.bf16.gmra.mrb[56].mxu1 %v674_v0 }
 0x16e   : > { %2078 = vmatprep.mubr.bf16.mxu1 %v678_v24 }
 0x174   : > { %2047 = vmatmul.mubr.bf16.gmra.mrb[60].mxu0 %v681_v35 }
 0x175   : > { %2079 = vmatmul.mubr.bf16.gmra.mrb[60].mxu1 %v682_v36 }
 0x1f7   : > { %v1972_v6 = vpop.f32.mrb[32].mxu0 }
 0x1f8   : > { %847 = vst.msk [vmem:[%s2453_s7 + $0x10] sm:$0xff] %vm844_vm1, %v1972_v6  ;;  %v781_v9 = vpop.f32.mrb[33].mxu0  ;;  %v2004_v30 = vpop.f32.mrb[32].mxu1 }
 0x1f9   : > { %845 = vst.msk [vmem:[%s2453_s7] sm:$0xff] %vm844_vm1, %v781_v9  ;;  %1822 = vst.msk [vmem:[%s2453_s7 + $0x90] sm:$0xff] %vm844_vm1, %v2004_v30  ;;  %v1973_v33 = vpop.f32.mrb[34].mxu0  ;;  %v960_v54 = vpop.f32.mrb[33].mxu1 }
 0x1fa   : > { %848 = vst.msk [vmem:[%s2453_s7 + $0x18] sm:$0xff] %vm844_vm1, %v1973_v33  ;;  %1820 = vst.msk [vmem:[%s2453_s7 + $0x80] sm:$0xff] %vm844_vm1, %v960_v54  ;;  %v784_v57 = vpop.f32.mrb[35].mxu0  ;;  %v2005_v16 = vpop.f32.mrb[34].mxu1 }
 0x1fb   : > { %846 = vst.msk [vmem:[%s2453_s7 + $0x8] sm:$0xff] %vm844_vm1, %v784_v57  ;;  %1823 = vst.msk [vmem:[%s2453_s7 + $0x98] sm:$0xff] %vm844_vm1, %v2005_v16  ;;  %v963_v19 = vpop.f32.mrb[35].mxu1 }
 0x1fc   : > { %1821 = vst.msk [vmem:[%s2453_s7 + $0x88] sm:$0xff] %vm844_vm1, %v963_v19 }
 0x1ff   : > { %v1565_v30 = vld [vmem:[%s2453_s7 + $0x10] sm:$0xff] (%p2741_p6) }
 0x200   : > { %v1561_v6 = vld [vmem:[%s2453_s7] sm:$0xff] (%p2741_p6)  ;;  %1566 = vst [vmem:[%s2592_s10 + $0x10] sm:$0xff] (%p2741_p6), %v1565_v30 }
 0x201   : > { %v1567_v33 = vld [vmem:[%s2453_s7 + $0x18] sm:$0xff] (%p2741_p6)  ;;  %1562 = vst [vmem:[%s2592_s10] sm:$0xff] (%p2741_p6), %v1561_v6 }
 0x202   : > { %v1563_v9 = vld [vmem:[%s2453_s7 + $0x8] sm:$0xff] (%p2741_p6)  ;;  %1568 = vst [vmem:[%s2592_s10 + $0x18] sm:$0xff] (%p2741_p6), %v1567_v33 }
 0x203   : > { %1564 = vst [vmem:[%s2592_s10 + $0x8] sm:$0xff] (%p2741_p6), %v1563_v9 }
 0x207   : > { %v1976_v37 = vpop.f32.mrb[36].mxu0 }
 0x208   : > { %851 = vst.msk [vmem:[%s2453_s7 + $0x30] sm:$0xff] %vm844_vm1, %v1976_v37  ;;  %v797_v38 = vpop.f32.mrb[37].mxu0  ;;  %v2008_v39 = vpop.f32.mrb[36].mxu1 }
 0x209   : > { %849 = vst.msk [vmem:[%s2453_s7 + $0x20] sm:$0xff] %vm844_vm1, %v797_v38  ;;  %1826 = vst.msk [vmem:[%s2453_s7 + $0xb0] sm:$0xff] %vm844_vm1, %v2008_v39  ;;  %v1977_v40 = vpop.f32.mrb[38].mxu0  ;;  %v976_v41 = vpop.f32.mrb[37].mxu1 }
 0x20a   : > { %852 = vst.msk [vmem:[%s2453_s7 + $0x38] sm:$0xff] %vm844_vm1, %v1977_v40  ;;  %1824 = vst.msk [vmem:[%s2453_s7 + $0xa0] sm:$0xff] %vm844_vm1, %v976_v41  ;;  %v800_v42 = vpop.f32.mrb[39].mxu0  ;;  %v2009_v43 = vpop.f32.mrb[38].mxu1 }
 0x20b   : > { %850 = vst.msk [vmem:[%s2453_s7 + $0x28] sm:$0xff] %vm844_vm1, %v800_v42  ;;  %1827 = vst.msk [vmem:[%s2453_s7 + $0xb8] sm:$0xff] %vm844_vm1, %v2009_v43  ;;  %v979_v44 = vpop.f32.mrb[39].mxu1 }
 0x20c   : > { %1825 = vst.msk [vmem:[%s2453_s7 + $0xa8] sm:$0xff] %vm844_vm1, %v979_v44 }
 0x20f   : > { %v1573_v16 = vld [vmem:[%s2453_s7 + $0x30] sm:$0xff] (%p2741_p6) }
 0x210   : > { %v1569_v54 = vld [vmem:[%s2453_s7 + $0x20] sm:$0xff] (%p2741_p6)  ;;  %1574 = vst [vmem:[%s2592_s10 + $0x30] sm:$0xff] (%p2741_p6), %v1573_v16 }
 0x211   : > { %1570 = vst [vmem:[%s2592_s10 + $0x20] sm:$0xff] (%p2741_p6), %v1569_v54  ;;  %v1575_v19 = vld [vmem:[%s2453_s7 + $0x38] sm:$0xff] (%p2741_p6) }
 0x212   : > { %v1571_v57 = vld [vmem:[%s2453_s7 + $0x28] sm:$0xff] (%p2741_p6)  ;;  %1576 = vst [vmem:[%s2592_s10 + $0x38] sm:$0xff] (%p2741_p6), %v1575_v19 }
 0x213   : > { %1572 = vst [vmem:[%s2592_s10 + $0x28] sm:$0xff] (%p2741_p6), %v1571_v57 }
 0x217   : > { %v1980_v45 = vpop.f32.mrb[40].mxu0 }
 0x218   : > { %855 = vst.msk [vmem:[%s2453_s7 + $0x50] sm:$0xff] %vm844_vm1, %v1980_v45  ;;  %v813_v46 = vpop.f32.mrb[41].mxu0  ;;  %v2012_v47 = vpop.f32.mrb[40].mxu1  ;;  %v1593_v45 = vld [vmem:[%s2453_s7 + $0x80] sm:$0xff] (%p2741_p6) }
 0x219   : > { %853 = vst.msk [vmem:[%s2453_s7 + $0x40] sm:$0xff] %vm844_vm1, %v813_v46  ;;  %1830 = vst.msk [vmem:[%s2453_s7 + $0xd0] sm:$0xff] %vm844_vm1, %v2012_v47  ;;  %v1981_v48 = vpop.f32.mrb[42].mxu0  ;;  %v992_v49 = vpop.f32.mrb[41].mxu1  ;;  %v1595_v46 = vld [vmem:[%s2453_s7 + $0x88] sm:$0xff] (%p2741_p6)  ;;  %v1597_v47 = vld [vmem:[%s2453_s7 + $0x90] sm:$0xff] (%p2741_p6) }
 0x21a   : > { %856 = vst.msk [vmem:[%s2453_s7 + $0x58] sm:$0xff] %vm844_vm1, %v1981_v48  ;;  %1828 = vst.msk [vmem:[%s2453_s7 + $0xc0] sm:$0xff] %vm844_vm1, %v992_v49  ;;  %v816_v50 = vpop.f32.mrb[43].mxu0  ;;  %v2013_v51 = vpop.f32.mrb[42].mxu1  ;;  %v1599_v48 = vld [vmem:[%s2453_s7 + $0x98] sm:$0xff] (%p2741_p6)  ;;  %v1601_v49 = vld [vmem:[%s2453_s7 + $0xa0] sm:$0xff] (%p2741_p6) }
 0x21b   : > { %854 = vst.msk [vmem:[%s2453_s7 + $0x48] sm:$0xff] %vm844_vm1, %v816_v50  ;;  %1831 = vst.msk [vmem:[%s2453_s7 + $0xd8] sm:$0xff] %vm844_vm1, %v2013_v51  ;;  %v995_v52 = vpop.f32.mrb[43].mxu1  ;;  %v1603_v50 = vld [vmem:[%s2453_s7 + $0xa8] sm:$0xff] (%p2741_p6)  ;;  %v1605_v51 = vld [vmem:[%s2453_s7 + $0xb0] sm:$0xff] (%p2741_p6) }
 0x21c   : > { %1829 = vst.msk [vmem:[%s2453_s7 + $0xc8] sm:$0xff] %vm844_vm1, %v995_v52  ;;  %1594 = vst [vmem:[%s2592_s10 + $0x100] sm:$0xff] (%p2741_p6), %v1593_v45  ;;  %v1607_v52 = vld [vmem:[%s2453_s7 + $0xb8] sm:$0xff] (%p2741_p6) }
 0x21d   : > { %1596 = vst [vmem:[%s2592_s10 + $0x108] sm:$0xff] (%p2741_p6), %v1595_v46  ;;  %1598 = vst [vmem:[%s2592_s10 + $0x110] sm:$0xff] (%p2741_p6), %v1597_v47 }
 0x21e   : > { %1600 = vst [vmem:[%s2592_s10 + $0x118] sm:$0xff] (%p2741_p6), %v1599_v48  ;;  %1602 = vst [vmem:[%s2592_s10 + $0x120] sm:$0xff] (%p2741_p6), %v1601_v49 }
 0x21f   : > { %v1581_v39 = vld [vmem:[%s2453_s7 + $0x50] sm:$0xff] (%p2741_p6)  ;;  %1604 = vst [vmem:[%s2592_s10 + $0x128] sm:$0xff] (%p2741_p6), %v1603_v50  ;;  %1606 = vst [vmem:[%s2592_s10 + $0x130] sm:$0xff] (%p2741_p6), %v1605_v51 }
 0x220   : > { %v1577_v37 = vld [vmem:[%s2453_s7 + $0x40] sm:$0xff] (%p2741_p6)  ;;  %1582 = vst [vmem:[%s2592_s10 + $0x50] sm:$0xff] (%p2741_p6), %v1581_v39  ;;  %1608 = vst [vmem:[%s2592_s10 + $0x138] sm:$0xff] (%p2741_p6), %v1607_v52 }
 0x221   : > { %1578 = vst [vmem:[%s2592_s10 + $0x40] sm:$0xff] (%p2741_p6), %v1577_v37  ;;  %v1583_v40 = vld [vmem:[%s2453_s7 + $0x58] sm:$0xff] (%p2741_p6) }
 0x222   : > { %v1579_v38 = vld [vmem:[%s2453_s7 + $0x48] sm:$0xff] (%p2741_p6)  ;;  %1584 = vst [vmem:[%s2592_s10 + $0x58] sm:$0xff] (%p2741_p6), %v1583_v40 }
 0x223   : > { %1580 = vst [vmem:[%s2592_s10 + $0x48] sm:$0xff] (%p2741_p6), %v1579_v38 }
 0x227   : > { %v1984_v53 = vpop.f32.mrb[44].mxu0 }
 0x228   : > { %859 = vst.msk [vmem:[%s2453_s7 + $0x70] sm:$0xff] %vm844_vm1, %v1984_v53  ;;  %v829_v55 = vpop.f32.mrb[45].mxu0  ;;  %v2016_v56 = vpop.f32.mrb[44].mxu1  ;;  %v1609_v53 = vld [vmem:[%s2453_s7 + $0xc0] sm:$0xff] (%p2741_p6) }
 0x229   : > { %857 = vst.msk [vmem:[%s2453_s7 + $0x60] sm:$0xff] %vm844_vm1, %v829_v55  ;;  %1834 = vst.msk [vmem:[%s2453_s7 + $0xf0] sm:$0xff] %vm844_vm1, %v2016_v56  ;;  %v1985_v58 = vpop.f32.mrb[46].mxu0  ;;  %v1008_v59 = vpop.f32.mrb[45].mxu1  ;;  %v1611_v55 = vld [vmem:[%s2453_s7 + $0xc8] sm:$0xff] (%p2741_p6)  ;;  %v1613_v56 = vld [vmem:[%s2453_s7 + $0xd0] sm:$0xff] (%p2741_p6) }
 0x22a   : > { %860 = vst.msk [vmem:[%s2453_s7 + $0x78] sm:$0xff] %vm844_vm1, %v1985_v58  ;;  %1832 = vst.msk [vmem:[%s2453_s7 + $0xe0] sm:$0xff] %vm844_vm1, %v1008_v59  ;;  %v832_v60 = vpop.f32.mrb[47].mxu0  ;;  %v2017_v61 = vpop.f32.mrb[46].mxu1  ;;  %v1615_v58 = vld [vmem:[%s2453_s7 + $0xd8] sm:$0xff] (%p2741_p6) }
 0x22b   : > { %858 = vst.msk [vmem:[%s2453_s7 + $0x68] sm:$0xff] %vm844_vm1, %v832_v60  ;;  %1835 = vst.msk [vmem:[%s2453_s7 + $0xf8] sm:$0xff] %vm844_vm1, %v2017_v61  ;;  %v1011_v62 = vpop.f32.mrb[47].mxu1 }
 0x22c   : > { %1833 = vst.msk [vmem:[%s2453_s7 + $0xe8] sm:$0xff] %vm844_vm1, %v1011_v62  ;;  %1610 = vst [vmem:[%s2592_s10 + $0x140] sm:$0xff] (%p2741_p6), %v1609_v53 }
 0x22d   : > { %1612 = vst [vmem:[%s2592_s10 + $0x148] sm:$0xff] (%p2741_p6), %v1611_v55  ;;  %1614 = vst [vmem:[%s2592_s10 + $0x150] sm:$0xff] (%p2741_p6), %v1613_v56 }
 0x22e   : > { %1616 = vst [vmem:[%s2592_s10 + $0x158] sm:$0xff] (%p2741_p6), %v1615_v58 }
 0x22f   : > { %v2036_v63 = vpop.f32.mrb[48].mxu0  ;;  %v1589_v43 = vld [vmem:[%s2453_s7 + $0x70] sm:$0xff] (%p2741_p6) }
 0x230   : > { %1846 = vst.msk [vmem:[%s2453_s7 + $0x110] sm:$0xff] %vm844_vm1, %v2036_v63  ;;  %v1139_v0 = vpop.f32.mrb[49].mxu0  ;;  %v2068_v1 = vpop.f32.mrb[48].mxu1  ;;  %v1585_v41 = vld [vmem:[%s2453_s7 + $0x60] sm:$0xff] (%p2741_p6)  ;;  %1590 = vst [vmem:[%s2592_s10 + $0x70] sm:$0xff] (%p2741_p6), %v1589_v43  ;;  %v1621_v61 = vld [vmem:[%s2453_s7 + $0xf0] sm:$0xff] (%p2741_p6) }
 0x231   : > { %1844 = vst.msk [vmem:[%s2453_s7 + $0x100] sm:$0xff] %vm844_vm1, %v1139_v0  ;;  %1870 = vst.msk [vmem:[%s2453_s7 + $0x190] sm:$0xff] %vm844_vm1, %v2068_v1  ;;  %v2037_v2 = vpop.f32.mrb[50].mxu0  ;;  %v1318_v3 = vpop.f32.mrb[49].mxu1  ;;  %v1591_v44 = vld [vmem:[%s2453_s7 + $0x78] sm:$0xff] (%p2741_p6)  ;;  %v1617_v59 = vld [vmem:[%s2453_s7 + $0xe0] sm:$0xff] (%p2741_p6) }
 0x232   : > { %1847 = vst.msk [vmem:[%s2453_s7 + $0x118] sm:$0xff] %vm844_vm1, %v2037_v2  ;;  %1868 = vst.msk [vmem:[%s2453_s7 + $0x180] sm:$0xff] %vm844_vm1, %v1318_v3  ;;  %v1142_v4 = vpop.f32.mrb[51].mxu0  ;;  %v2069_v5 = vpop.f32.mrb[50].mxu1  ;;  %v1587_v42 = vld [vmem:[%s2453_s7 + $0x68] sm:$0xff] (%p2741_p6)  ;;  %v1623_v62 = vld [vmem:[%s2453_s7 + $0xf8] sm:$0xff] (%p2741_p6) }
 0x233   : > { %1845 = vst.msk [vmem:[%s2453_s7 + $0x108] sm:$0xff] %vm844_vm1, %v1142_v4  ;;  %1871 = vst.msk [vmem:[%s2453_s7 + $0x198] sm:$0xff] %vm844_vm1, %v2069_v5  ;;  %v1321_v7 = vpop.f32.mrb[51].mxu1  ;;  %v1619_v60 = vld [vmem:[%s2453_s7 + $0xe8] sm:$0xff] (%p2741_p6) }
 0x234   : > { %1869 = vst.msk [vmem:[%s2453_s7 + $0x188] sm:$0xff] %vm844_vm1, %v1321_v7  ;;  %1586 = vst [vmem:[%s2592_s10 + $0x60] sm:$0xff] (%p2741_p6), %v1585_v41 }
 0x235   : > { %1588 = vst [vmem:[%s2592_s10 + $0x68] sm:$0xff] (%p2741_p6), %v1587_v42  ;;  %1592 = vst [vmem:[%s2592_s10 + $0x78] sm:$0xff] (%p2741_p6), %v1591_v44 }
 0x236   : > { %1618 = vst [vmem:[%s2592_s10 + $0x160] sm:$0xff] (%p2741_p6), %v1617_v59  ;;  %1620 = vst [vmem:[%s2592_s10 + $0x168] sm:$0xff] (%p2741_p6), %v1619_v60 }
 0x237   : > { %v2040_v8 = vpop.f32.mrb[52].mxu0  ;;  %1622 = vst [vmem:[%s2592_s10 + $0x170] sm:$0xff] (%p2741_p6), %v1621_v61  ;;  %1624 = vst [vmem:[%s2592_s10 + $0x178] sm:$0xff] (%p2741_p6), %v1623_v62  ;;  %v1629_v1 = vld [vmem:[%s2453_s7 + $0x110] sm:$0xff] (%p2741_p6) }
 0x238   : > { %1850 = vst.msk [vmem:[%s2453_s7 + $0x130] sm:$0xff] %vm844_vm1, %v2040_v8  ;;  %v1155_v10 = vpop.f32.mrb[53].mxu0  ;;  %v2072_v11 = vpop.f32.mrb[52].mxu1  ;;  %v1625_v63 = vld [vmem:[%s2453_s7 + $0x100] sm:$0xff] (%p2741_p6)  ;;  %1630 = vst [vmem:[%s2592_s10 + $0x210] sm:$0xff] (%p2741_p6), %v1629_v1 }
 0x239   : > { %1848 = vst.msk [vmem:[%s2453_s7 + $0x120] sm:$0xff] %vm844_vm1, %v1155_v10  ;;  %1874 = vst.msk [vmem:[%s2453_s7 + $0x1b0] sm:$0xff] %vm844_vm1, %v2072_v11  ;;  %v2041_v12 = vpop.f32.mrb[54].mxu0  ;;  %v1334_v13 = vpop.f32.mrb[53].mxu1  ;;  %v1631_v2 = vld [vmem:[%s2453_s7 + $0x118] sm:$0xff] (%p2741_p6) }
 0x23a   : > { %1851 = vst.msk [vmem:[%s2453_s7 + $0x138] sm:$0xff] %vm844_vm1, %v2041_v12  ;;  %1872 = vst.msk [vmem:[%s2453_s7 + $0x1a0] sm:$0xff] %vm844_vm1, %v1334_v13  ;;  %v1158_v14 = vpop.f32.mrb[55].mxu0  ;;  %v2073_v15 = vpop.f32.mrb[54].mxu1  ;;  %v1627_v0 = vld [vmem:[%s2453_s7 + $0x108] sm:$0xff] (%p2741_p6) }
 0x23b   : > { %1849 = vst.msk [vmem:[%s2453_s7 + $0x128] sm:$0xff] %vm844_vm1, %v1158_v14  ;;  %1875 = vst.msk [vmem:[%s2453_s7 + $0x1b8] sm:$0xff] %vm844_vm1, %v2073_v15  ;;  %v1337_v17 = vpop.f32.mrb[55].mxu1 }
 0x23c   : > { %1873 = vst.msk [vmem:[%s2453_s7 + $0x1a8] sm:$0xff] %vm844_vm1, %v1337_v17  ;;  %1626 = vst [vmem:[%s2592_s10 + $0x200] sm:$0xff] (%p2741_p6), %v1625_v63 }
 0x23d   : > { %1628 = vst [vmem:[%s2592_s10 + $0x208] sm:$0xff] (%p2741_p6), %v1627_v0  ;;  %1632 = vst [vmem:[%s2592_s10 + $0x218] sm:$0xff] (%p2741_p6), %v1631_v2 }
 0x23f   : > { %v2044_v18 = vpop.f32.mrb[56].mxu0  ;;  %v1637_v5 = vld [vmem:[%s2453_s7 + $0x130] sm:$0xff] (%p2741_p6) }
 0x240   : > { %1854 = vst.msk [vmem:[%s2453_s7 + $0x150] sm:$0xff] %vm844_vm1, %v2044_v18  ;;  %v1171_v20 = vpop.f32.mrb[57].mxu0  ;;  %v2076_v21 = vpop.f32.mrb[56].mxu1  ;;  %v1633_v3 = vld [vmem:[%s2453_s7 + $0x120] sm:$0xff] (%p2741_p6)  ;;  %1638 = vst [vmem:[%s2592_s10 + $0x230] sm:$0xff] (%p2741_p6), %v1637_v5 }
 0x241   : > { %1852 = vst.msk [vmem:[%s2453_s7 + $0x140] sm:$0xff] %vm844_vm1, %v1171_v20  ;;  %1878 = vst.msk [vmem:[%s2453_s7 + $0x1d0] sm:$0xff] %vm844_vm1, %v2076_v21  ;;  %v2045_v22 = vpop.f32.mrb[58].mxu0  ;;  %v1350_v23 = vpop.f32.mrb[57].mxu1  ;;  %v1639_v7 = vld [vmem:[%s2453_s7 + $0x138] sm:$0xff] (%p2741_p6)  ;;  %v1657_v18 = vld [vmem:[%s2453_s7 + $0x180] sm:$0xff] (%p2741_p6) }
 0x242   : > { %1855 = vst.msk [vmem:[%s2453_s7 + $0x158] sm:$0xff] %vm844_vm1, %v2045_v22  ;;  %1876 = vst.msk [vmem:[%s2453_s7 + $0x1c0] sm:$0xff] %vm844_vm1, %v1350_v23  ;;  %v1174_v24 = vpop.f32.mrb[59].mxu0  ;;  %v2077_v25 = vpop.f32.mrb[58].mxu1  ;;  %v1635_v4 = vld [vmem:[%s2453_s7 + $0x128] sm:$0xff] (%p2741_p6)  ;;  %v1661_v21 = vld [vmem:[%s2453_s7 + $0x190] sm:$0xff] (%p2741_p6) }
 0x243   : > { %1853 = vst.msk [vmem:[%s2453_s7 + $0x148] sm:$0xff] %vm844_vm1, %v1174_v24  ;;  %1879 = vst.msk [vmem:[%s2453_s7 + $0x1d8] sm:$0xff] %vm844_vm1, %v2077_v25  ;;  %v1353_v26 = vpop.f32.mrb[59].mxu1  ;;  %v1659_v20 = vld [vmem:[%s2453_s7 + $0x188] sm:$0xff] (%p2741_p6)  ;;  %v1663_v22 = vld [vmem:[%s2453_s7 + $0x198] sm:$0xff] (%p2741_p6) }
 0x244   : > { %1877 = vst.msk [vmem:[%s2453_s7 + $0x1c8] sm:$0xff] %vm844_vm1, %v1353_v26  ;;  %1634 = vst [vmem:[%s2592_s10 + $0x220] sm:$0xff] (%p2741_p6), %v1633_v3  ;;  %v1665_v23 = vld [vmem:[%s2453_s7 + $0x1a0] sm:$0xff] (%p2741_p6)  ;;  %v1667_v24 = vld [vmem:[%s2453_s7 + $0x1a8] sm:$0xff] (%p2741_p6) }
 0x245   : > { %1636 = vst [vmem:[%s2592_s10 + $0x228] sm:$0xff] (%p2741_p6), %v1635_v4  ;;  %1640 = vst [vmem:[%s2592_s10 + $0x238] sm:$0xff] (%p2741_p6), %v1639_v7  ;;  %v1669_v25 = vld [vmem:[%s2453_s7 + $0x1b0] sm:$0xff] (%p2741_p6)  ;;  %v1671_v26 = vld [vmem:[%s2453_s7 + $0x1b8] sm:$0xff] (%p2741_p6) }
 0x246   : > { %1404 = sbr.rel (!%p2741_p6) target bundleno = 598 (0x256), region = 40  ;;  %1658 = vst [vmem:[%s2592_s10 + $0x300] sm:$0xff] (%p2741_p6), %v1657_v18  ;;  %1660 = vst [vmem:[%s2592_s10 + $0x308] sm:$0xff] (%p2741_p6), %v1659_v20 }
 0x247   : > { %v2048_v27 = vpop.f32.mrb[60].mxu0  ;;  %v1645_v11 = vld [vmem:[%s2453_s7 + $0x150] sm:$0xff] (%p2741_p6)  ;;  %1662 = vst [vmem:[%s2592_s10 + $0x310] sm:$0xff] (%p2741_p6), %v1661_v21  ;;  %1664 = vst [vmem:[%s2592_s10 + $0x318] sm:$0xff] (%p2741_p6), %v1663_v22 }
 0x248   : > { %1858 = vst.msk [vmem:[%s2453_s7 + $0x170] sm:$0xff] %vm844_vm1, %v2048_v27  ;;  %v1187_v28 = vpop.f32.mrb[61].mxu0  ;;  %v2080_v29 = vpop.f32.mrb[60].mxu1  ;;  %v1641_v8 = vld [vmem:[%s2453_s7 + $0x140] sm:$0xff] (%p2741_p6)  ;;  %1646 = vst [vmem:[%s2592_s10 + $0x250] sm:$0xff] (%p2741_p6), %v1645_v11 }
 0x249   : > { %1856 = vst.msk [vmem:[%s2453_s7 + $0x160] sm:$0xff] %vm844_vm1, %v1187_v28  ;;  %1882 = vst.msk [vmem:[%s2453_s7 + $0x1f0] sm:$0xff] %vm844_vm1, %v2080_v29  ;;  %v2049_v31 = vpop.f32.mrb[62].mxu0  ;;  %v1366_v32 = vpop.f32.mrb[61].mxu1  ;;  %v1647_v12 = vld [vmem:[%s2453_s7 + $0x158] sm:$0xff] (%p2741_p6)  ;;  %v1673_v27 = vld [vmem:[%s2453_s7 + $0x1c0] sm:$0xff] (%p2741_p6) }
 0x24a   : > { %1859 = vst.msk [vmem:[%s2453_s7 + $0x178] sm:$0xff] %vm844_vm1, %v2049_v31  ;;  %1880 = vst.msk [vmem:[%s2453_s7 + $0x1e0] sm:$0xff] %vm844_vm1, %v1366_v32  ;;  %v1190_v34 = vpop.f32.mrb[63].mxu0  ;;  %v2081_v35 = vpop.f32.mrb[62].mxu1  ;;  %v1643_v10 = vld [vmem:[%s2453_s7 + $0x148] sm:$0xff] (%p2741_p6)  ;;  %v1677_v29 = vld [vmem:[%s2453_s7 + $0x1d0] sm:$0xff] (%p2741_p6) }
 0x24b   : > { %1857 = vst.msk [vmem:[%s2453_s7 + $0x168] sm:$0xff] %vm844_vm1, %v1190_v34  ;;  %1883 = vst.msk [vmem:[%s2453_s7 + $0x1f8] sm:$0xff] %vm844_vm1, %v2081_v35  ;;  %v1369_v36 = vpop.f32.mrb[63].mxu1  ;;  %v1675_v28 = vld [vmem:[%s2453_s7 + $0x1c8] sm:$0xff] (%p2741_p6)  ;;  %v1679_v31 = vld [vmem:[%s2453_s7 + $0x1d8] sm:$0xff] (%p2741_p6) }
 0x24c   : > { %1881 = vst.msk [vmem:[%s2453_s7 + $0x1e8] sm:$0xff] %vm844_vm1, %v1369_v36  ;;  %1642 = vst [vmem:[%s2592_s10 + $0x240] sm:$0xff] (%p2741_p6), %v1641_v8 }
 0x24d   : > { %1644 = vst [vmem:[%s2592_s10 + $0x248] sm:$0xff] %v1643_v10  ;;  %1648 = vst [vmem:[%s2592_s10 + $0x258] sm:$0xff] %v1647_v12 }
 0x24e   : > { %1666 = vst [vmem:[%s2592_s10 + $0x320] sm:$0xff] %v1665_v23  ;;  %1668 = vst [vmem:[%s2592_s10 + $0x328] sm:$0xff] %v1667_v24 }
 0x24f   : > { %v1653_v15 = vld [vmem:[%s2453_s7 + $0x170] sm:$0xff]  ;;  %1670 = vst [vmem:[%s2592_s10 + $0x330] sm:$0xff] %v1669_v25  ;;  %1672 = vst [vmem:[%s2592_s10 + $0x338] sm:$0xff] %v1671_v26 }
 0x250   : > { %v1649_v13 = vld [vmem:[%s2453_s7 + $0x160] sm:$0xff]  ;;  %1654 = vst [vmem:[%s2592_s10 + $0x270] sm:$0xff] %v1653_v15  ;;  %1674 = vst [vmem:[%s2592_s10 + $0x340] sm:$0xff] %v1673_v27  ;;  %v1685_v35 = vld [vmem:[%s2453_s7 + $0x1f0] sm:$0xff] }
 0x251   : > { %1650 = vst [vmem:[%s2592_s10 + $0x260] sm:$0xff] %v1649_v13  ;;  %v1655_v17 = vld [vmem:[%s2453_s7 + $0x178] sm:$0xff]  ;;  %1676 = vst [vmem:[%s2592_s10 + $0x348] sm:$0xff] %v1675_v28  ;;  %v1681_v32 = vld [vmem:[%s2453_s7 + $0x1e0] sm:$0xff] }
 0x252   : > { %v1651_v14 = vld [vmem:[%s2453_s7 + $0x168] sm:$0xff]  ;;  %1656 = vst [vmem:[%s2592_s10 + $0x278] sm:$0xff] %v1655_v17  ;;  %1678 = vst [vmem:[%s2592_s10 + $0x350] sm:$0xff] %v1677_v29  ;;  %v1687_v36 = vld [vmem:[%s2453_s7 + $0x1f8] sm:$0xff] }
 0x253   : > { %1652 = vst [vmem:[%s2592_s10 + $0x268] sm:$0xff] %v1651_v14  ;;  %1680 = vst [vmem:[%s2592_s10 + $0x358] sm:$0xff] %v1679_v31  ;;  %v1683_v34 = vld [vmem:[%s2453_s7 + $0x1e8] sm:$0xff] }
 0x254   : > { %1682 = vst [vmem:[%s2592_s10 + $0x360] sm:$0xff] %v1681_v32  ;;  %1684 = vst [vmem:[%s2592_s10 + $0x368] sm:$0xff] %v1683_v34 }
 0x255   : > { %1686 = vst [vmem:[%s2592_s10 + $0x370] sm:$0xff] %v1685_v35  ;;  %1688 = vst [vmem:[%s2592_s10 + $0x378] sm:$0xff] %v1687_v36 }
 0x256 PF: > { %p11_p7 = scmp.ge.s32.totalorder %s2279_s16, 4   ;;  %s2742_s12 = smov %s2234_s13 }
 0x257   : > { %s2743_s13 = smov %s2287_s19  ;;  %s2744_s14 = smov %s2279_s16 }
 0x258   :  { %13 = sbr.rel (!%p11_p7) target bundleno = 2 (0x2), region = 111 }
 0x25f   :  { %1704 = vsyncpa [#allocation3], 1 }
 0x260   :  { %1706 = vsyncpa [#allocation3 + $0x1], 1 }

</bundles_post_ra>
